<compile_context>
chip_gen: v6e
topology: v6e:2x2x1
jax: 0.10.0
libtpu: 0.0.40
codegen_flags: <defaults>
</compile_context>

<pallas_src>
import functools

import jax
import jax.numpy as jnp
from jax import lax
from jax.experimental import pallas as pl
from jax.experimental.pallas import tpu as pltpu


_OUT_SUB, _OUT_LANE = 8, 128  # one vreg-aligned (8,128) f32 partial-sum slab per tile


def _ce_partial_kernel(x_ref, t_ref, out_ref, *, batch, tile_rows, mask_rows):
    """Per-tile soft-target cross-entropy partial (raw) sum.

    x_ref, t_ref : (tile_rows, C) VMEM tiles (any float dtype; upcast to f32).
    out_ref      : (8, 128) f32 slab; tile's partial sum broadcast into it so the
                   store is an unmasked full-block vst.
    """
    x = x_ref[...].astype(jnp.float32)
    t = t_ref[...].astype(jnp.float32)

    if mask_rows:
        # Last tile can hang past the batch: OOB rows contain unspecified VMEM
        # data, so zero both operands (also guards against NaN/Inf garbage).
        row = pl.program_id(0) * tile_rows + lax.broadcasted_iota(jnp.int32, x.shape, 0)
        valid = row < batch
        x = jnp.where(valid, x, 0.0)
        t = jnp.where(valid, t, 0.0)

    # Numerically-stable log-sum-exp along the class axis.
    m = jnp.max(x, axis=-1, keepdims=True)                                   # (TB, 1)
    lse = jnp.log(jnp.sum(jnp.exp(x - m), axis=-1, keepdims=True)) + m       # (TB, 1)

    # -sum_c t * log_softmax(x) = lse*sum(t) - sum(t*x): two lane reductions,
    # no (TB, C) broadcast of lse; exact for unnormalized soft targets too.
    s_t = jnp.sum(t, axis=-1, keepdims=True)                                 # (TB, 1)
    s_tx = jnp.sum(t * x, axis=-1, keepdims=True)                            # (TB, 1)
    partial = jnp.sum(lse * s_t - s_tx)                                      # scalar

    out_ref[...] = jnp.full((_OUT_SUB, _OUT_LANE), partial, dtype=jnp.float32)


def ce_loss(inputs, targets, reduction="mean", tile_rows=None):
    """Pallas TPU equivalent of F.cross_entropy(inputs, targets, reduction=...)
    with soft (probability) targets of shape (B, C)."""
    assert inputs.shape == targets.shape and inputs.ndim == 2
    B, C = inputs.shape

    # Batch tile: 512 rows (f32: ~2 MiB/input/buffer; ~8 MiB total double-buffered,
    # within every generation's scoped-VMEM default). Small B -> single full block.
    if tile_rows is None:
        tile_rows = 512 if B >= 512 else B
    if tile_rows != B:
        assert tile_rows % 8 == 0, "tile_rows must be a multiple of 8 (or == batch)"
    tile_rows = min(tile_rows, B)
    num_tiles = pl.cdiv(B, tile_rows)
    mask_rows = (B % tile_rows) != 0

    kernel = functools.partial(
        _ce_partial_kernel, batch=B, tile_rows=tile_rows, mask_rows=mask_rows
    )

    bytes_in = B * C * (jnp.dtype(inputs.dtype).itemsize + jnp.dtype(targets.dtype).itemsize)
    cost = pl.CostEstimate(
        flops=6 * B * C,
        transcendentals=B * C,  # exp per element (plus ~B logs)
        bytes_accessed=bytes_in + num_tiles * _OUT_SUB * _OUT_LANE * 4,
    )

    out = pl.pallas_call(
        kernel,
        out_shape=jax.ShapeDtypeStruct((num_tiles * _OUT_SUB, _OUT_LANE), jnp.float32),
        grid=(num_tiles,),
        in_specs=[
            pl.BlockSpec((tile_rows, C), lambda i: (i, 0)),
            pl.BlockSpec((tile_rows, C), lambda i: (i, 0)),
        ],
        out_specs=pl.BlockSpec((_OUT_SUB, _OUT_LANE), lambda i: (i, 0)),
        compiler_params=pltpu.CompilerParams(dimension_semantics=("parallel",)),
        cost_estimate=cost,
    )(inputs, targets)

    # One raw partial sum per tile; normalize once here (no divide-then-multiply).
    loss_sum = jnp.sum(out[0::_OUT_SUB, 0])

    if reduction == "mean":
        return loss_sum / jnp.float32(B)
    elif reduction == "sum":
        return loss_sum
    else:
        # TODO(synk): reduction='none' would need a per-row (B,) output spec.
        raise NotImplementedError(f"unsupported reduction: {reduction}")


def _ce_loss_ref(inputs, targets, reduction="mean"):
    logp = jax.nn.log_softmax(inputs.astype(jnp.float32), axis=-1)
    per_row = -jnp.sum(targets.astype(jnp.float32) * logp, axis=-1)
    return jnp.mean(per_row) if reduction == "mean" else jnp.sum(per_row)


if __name__ == "__main__":
    key = jax.random.PRNGKey(0)
    k1, k2 = jax.random.split(key)

    B, C = 8, 1004
    inputs = jax.random.normal(k1, (B, C), dtype=jnp.float32)
    # Soft targets: valid probability distributions over the 1004 classes.
    targets = jax.nn.softmax(jax.random.normal(k2, (B, C), dtype=jnp.float32), axis=-1)

    # 1) Default path (single tile, mean).
    loss = jax.block_until_ready(ce_loss(inputs, targets, reduction="mean"))
    ref = _ce_loss_ref(inputs, targets, "mean")
    assert jnp.allclose(loss, ref, rtol=1e-5, atol=1e-5), (loss, ref)

    # 2) Multi-tile + masked last tile + 'sum' path (exercised at small scale).
    B2 = 20
    k3, k4 = jax.random.split(k2)
    inputs2 = jax.random.normal(k3, (B2, C), dtype=jnp.float32)
    targets2 = jax.nn.softmax(jax.random.normal(k4, (B2, C), dtype=jnp.float32), axis=-1)
    loss2 = jax.block_until_ready(ce_loss(inputs2, targets2, reduction="sum", tile_rows=8))
    ref2 = _ce_loss_ref(inputs2, targets2, "sum")
    assert jnp.allclose(loss2, ref2, rtol=1e-5, atol=1e-5), (loss2, ref2)

    # 3) bf16 streaming path (inputs stay bf16 in HBM, f32 compute in-kernel).
    loss_bf = jax.block_until_ready(
        ce_loss(inputs.astype(jnp.bfloat16), targets.astype(jnp.bfloat16), "mean")
    )
    ref_bf = _ce_loss_ref(inputs.astype(jnp.bfloat16), targets.astype(jnp.bfloat16), "mean")
    assert jnp.allclose(loss_bf, ref_bf, rtol=1e-3, atol=1e-3), (loss_bf, ref_bf)

    print("KERNEL_OK")
</pallas_src>

<mosaic_0001>
module attributes {stable_mosaic.version = 11 : i64} {
  func.func @_ce_partial_kernel(%arg0: i32, %arg1: memref<8x1004xf32, #tpu.memory_space<vmem>>, %arg2: memref<8x1004xf32, #tpu.memory_space<vmem>>, %arg3: memref<8x128xf32, #tpu.memory_space<vmem>>) attributes {dimension_semantics = [#tpu.dimension_semantics<parallel>], iteration_bounds = array<i64: 1>, scalar_prefetch = 0 : i64, scratch_operands = 0 : i64, tpu.core_type = #tpu.core_type<tc>, window_params = [{transform_indices = @transform_0, window_bounds = array<i64: 8, 1004>}, {transform_indices = @transform_1, window_bounds = array<i64: 8, 1004>}, {transform_indices = @transform_2, window_bounds = array<i64: 8, 128>}]} {
    %c0 = arith.constant 0 : index
    %c0_0 = arith.constant 0 : index
    %0 = vector.load %arg1[%c0, %c0_0] : memref<8x1004xf32, #tpu.memory_space<vmem>>, vector<8x1004xf32>
    %c0_1 = arith.constant 0 : index
    %c0_2 = arith.constant 0 : index
    %1 = vector.load %arg2[%c0_1, %c0_2] : memref<8x1004xf32, #tpu.memory_space<vmem>>, vector<8x1004xf32>
    %cst = arith.constant dense<0xFF800000> : vector<8xf32>
    %2 = vector.multi_reduction <maximumf>, %0, %cst [1] : vector<8x1004xf32> to vector<8xf32>
    %3 = vector.shape_cast %2 : vector<8xf32> to vector<8x1xf32>
    %4 = vector.broadcast %3 : vector<8x1xf32> to vector<8x1004xf32>
    %5 = arith.subf %0, %4 : vector<8x1004xf32>
    %6 = math.exp %5 : vector<8x1004xf32>
    %cst_3 = arith.constant dense<0.000000e+00> : vector<8xf32>
    %7 = vector.multi_reduction <add>, %6, %cst_3 [1] : vector<8x1004xf32> to vector<8xf32>
    %8 = vector.shape_cast %7 : vector<8xf32> to vector<8x1xf32>
    %9 = math.log %8 : vector<8x1xf32>
    %10 = arith.addf %9, %3 : vector<8x1xf32>
    %cst_4 = arith.constant dense<0.000000e+00> : vector<8xf32>
    %11 = vector.multi_reduction <add>, %1, %cst_4 [1] : vector<8x1004xf32> to vector<8xf32>
    %12 = vector.shape_cast %11 : vector<8xf32> to vector<8x1xf32>
    %13 = arith.mulf %1, %0 : vector<8x1004xf32>
    %cst_5 = arith.constant dense<0.000000e+00> : vector<8xf32>
    %14 = vector.multi_reduction <add>, %13, %cst_5 [1] : vector<8x1004xf32> to vector<8xf32>
    %15 = vector.shape_cast %14 : vector<8xf32> to vector<8x1xf32>
    %16 = arith.mulf %10, %12 : vector<8x1xf32>
    %17 = arith.subf %16, %15 : vector<8x1xf32>
    %18 = vector.shape_cast %17 : vector<8x1xf32> to vector<1x8x1xf32>
    %cst_6 = arith.constant dense<0.000000e+00> : vector<1xf32>
    %19 = vector.multi_reduction <add>, %18, %cst_6 [1, 2] : vector<1x8x1xf32> to vector<1xf32>
    %20 = vector.shape_cast %19 : vector<1xf32> to vector<1x1x1xf32>
    %21 = vector.extract %20[0, 0, 0] : f32 from vector<1x1x1xf32>
    %22 = vector.broadcast %21 : f32 to vector<8x128xf32>
    %c0_7 = arith.constant 0 : index
    %c0_8 = arith.constant 0 : index
    %23 = vector.load %arg3[%c0_7, %c0_8] : memref<8x128xf32, #tpu.memory_space<vmem>>, vector<8x128xf32>
    tpu.vector_store %arg3[%c0_7, %c0_8], %22 {strides = array<i32>} : memref<8x128xf32, #tpu.memory_space<vmem>>, vector<8x128xf32>,
    return
  }
  func.func @transform_0(%arg0: i32) -> (i32, i32) {
    %c0_i32 = arith.constant 0 : i32
    %c0_i32_0 = arith.constant 0 : i32
    return %arg0, %c0_i32 : i32, i32
  }
  func.func @transform_1(%arg0: i32) -> (i32, i32) {
    %c0_i32 = arith.constant 0 : i32
    %c0_i32_0 = arith.constant 0 : i32
    return %arg0, %c0_i32 : i32, i32
  }
  func.func @transform_2(%arg0: i32) -> (i32, i32) {
    %c0_i32 = arith.constant 0 : i32
    %c0_i32_0 = arith.constant 0 : i32
    return %arg0, %c0_i32 : i32, i32
  }
}

</mosaic_0001>

<bundles_post_ra>
// kernel: tpu_custom_call.1
= control target key start
LH: loop header
LB: loop body
LE: loop exit
PB: predicated region body
PF: predicated region fallthrough
CT: control target
= control target key end

     0   :  { %7 = vsyncpa [#allocation3], 0  ;;  %s299_s0 = inlined_call_operand.hbm [shape: f32[8,1004], index: 0, kind: input, shape index: {}]   ;;  %s300_s1 = inlined_call_operand.hbm [shape: f32[8,1004], index: 1, kind: input, shape index: {}]   ;;  %s301_s2 = inlined_call_operand.hbm [shape: f32[8,128], index: 2, kind: output, shape index: {}]  }
   0x1   :  { %8 = vsyncpa [#allocation6], 0 }
   0x2   :  { %9 = vsyncpa [#allocation4], 0  ;;  %s248_s9 = smov [#allocation2]   ;;  %s249_s11 = smov [#allocation5]  }
   0x3   :  { %s16_s10 = sshll.u32 %s248_s9, 4  ;;  %s26_s12 = sshll.u32 %s249_s11, 4  ;;  %s17_s10 = int_to_ptr.vmem [resolvable:$true] %s16_s10  ;;  %s27_s12 = int_to_ptr.vmem [resolvable:$true] %s26_s12 }
   0x4   :  { %s190_s13 = scalar_lea.vmem %s17_s10, 1024  ;;  %p195_p1 = scmp.lt.s32.totalorder %s17_s10, %s17_s10 }
   0x5   :  { %p191_p0 = scmp.ne.s32.totalorder %s17_s10, %s190_s13  ;;  %p196_p2 = scmp.lt.s32.totalorder %s190_s13, %s190_s13 }
   0x7   :  { %p197_p3 = por %p196_p2, %p195_p1 }
   0x9   :  { %p198_p4 = pnand %p197_p3, %p191_p0 }
   0xb   :  { %201 = shalt.err (!%p198_p4)
}
   0xc   :  { %19 = dma.hbm_to_vmem [thread:$0]  %s299_s0, 1024, %s17_s10, [#allocation3]  }
   0xd   :  { %s210_s16 = scalar_lea.vmem %s27_s12, 1024  ;;  %p215_p6 = scmp.lt.s32.totalorder %s27_s12, %s27_s12 }
   0xe   :  { %p211_p5 = scmp.ne.s32.totalorder %s27_s12, %s210_s16  ;;  %p216_p7 = scmp.lt.s32.totalorder %s210_s16, %s210_s16 }
  0x10   :  { %p217_p8 = por %p216_p7, %p215_p6 }
  0x12   :  { %p218_p9 = pnand %p217_p8, %p211_p5 }
  0x14   :  { %221 = shalt.err (!%p218_p9)
}
  0x15   :  { %29 = dma.hbm_to_vmem [thread:$0]  %s300_s1, 1024, %s27_s12, [#allocation6]  }
  0x16   :  { %242 = dma.done.wait [#allocation3], 1024  }
  0x17   :  { %243 = vsyncadd [#allocation3], 4294966272 }
  0x18   :  { %244 = dma.done.wait [#allocation6], 1024  }
  0x19   :  { %245 = vsyncadd [#allocation6], 4294966272  ;;  %v36_v0 = vld [vmem:[#allocation2] sm:$0xff]  ;;  %v37_v1 = vld [vmem:[#allocation2 + $0x8] sm:$0xff]  ;;  %vm55_vm0 = vcmask 883712   ;;  %vm130_vm1 = vcmask 7168  }
  0x1a   :  { %v38_v2 = vld [vmem:[#allocation2 + $0x10] sm:$0xff]  ;;  %v39_v3 = vld [vmem:[#allocation2 + $0x18] sm:$0xff]  ;;  %v272_v4 = vld [vmem:[#allocation2 + $0x20] sm:$0xff]  ;;  %s250_s0 = smov [#allocation7]  }
  0x1b   :  { %v274_v5 = vld [vmem:[#allocation2 + $0x28] sm:$0xff]  ;;  %v276_v6 = vld [vmem:[#allocation2 + $0x30] sm:$0xff]  ;;  %v278_v7 = vld [vmem:[#allocation2 + $0x38] sm:$0xff]  ;;  %v52_v8 = vmax.f32 %v36_v0, %v272_v4  ;;  %s149_s1 = sshll.u32 %s250_s0, 4  ;;  %s150_s1 = int_to_ptr.vmem [resolvable:$true] %s149_s1 }
  0x1c   :  { %v53_v9 = vmax.f32 %v37_v1, %v274_v5  ;;  %v54_v10 = vmax.f32 %v38_v2, %v276_v6  ;;  %v56_v11 = vsel %vm55_vm0, %v278_v7, -inf  ;;  %v44_v16 = vld [vmem:[#allocation5] sm:$0xff]  ;;  %v45_v17 = vld [vmem:[#allocation5 + $0x8] sm:$0xff]  ;;  %v46_v20 = vld [vmem:[#allocation5 + $0x10] sm:$0xff]  ;;  %s222_s20 = scalar_lea.vmem %s150_s1, 128  ;;  %p227_p11 = scmp.lt.s32.totalorder %s150_s1, %s150_s1 }
  0x1d   :  { %v57_v12 = vmax.f32 %v39_v3, %v56_v11  ;;  %v110_v18 = vmul.f32 %v44_v16, %v36_v0  ;;  %v111_v19 = vmul.f32 %v45_v17, %v37_v1  ;;  %v112_v21 = vmul.f32 %v46_v20, %v38_v2  ;;  %v47_v23 = vld [vmem:[#allocation5 + $0x18] sm:$0xff]  ;;  %v48_v27 = vld [vmem:[#allocation5 + $0x20] sm:$0xff]  ;;  %v49_v28 = vld [vmem:[#allocation5 + $0x28] sm:$0xff]  ;;  %p223_p10 = scmp.ne.s32.totalorder %s150_s1, %s222_s20  ;;  %p228_p12 = scmp.lt.s32.totalorder %s222_s20, %s222_s20 }
  0x1e   :  { %v58_v13 = vmax.f32 %v52_v8, %v53_v9  ;;  %v100_v24 = vadd.f32 %v45_v17, %v44_v16  ;;  %v113_v25 = vmul.f32 %v47_v23, %v39_v3  ;;  %v114_v31 = vmul.f32 %v48_v27, %v272_v4  ;;  %v50_v34 = vld [vmem:[#allocation5 + $0x30] sm:$0xff]  ;;  %v51_v36 = vld [vmem:[#allocation5 + $0x38] sm:$0xff] }
  0x1f   :  { %v59_v14 = vmax.f32 %v54_v10, %v57_v12  ;;  %v118_v22 = vadd.f32 %v111_v19, %v110_v18  ;;  %v115_v32 = vmul.f32 %v49_v28, %v274_v5  ;;  %v116_v38 = vmul.f32 %v50_v34, %v276_v6  ;;  %p229_p13 = por %p228_p12, %p227_p11 }
  0x20   :  { %v101_v29 = vadd.f32 %v100_v24, %v46_v20  ;;  %v117_v39 = vmul.f32 %v51_v36, %v278_v7  ;;  %v106_v42 = vsel %vm55_vm0, %v51_v36, 0.0 }
  0x21   :  { %v60_v15 = vmax.f32 %v58_v13, %v59_v14  ;;  %v119_v26 = vadd.f32 %v118_v22, %v112_v21  ;;  %p230_p0 = pnand %p229_p13, %p223_p10 }
  0x22   :  { %v102_v33 = vadd.f32 %v101_v29, %v47_v23  ;;  %v124_v45 = vsel %vm55_vm0, %v117_v39, 0.0 }
  0x23   :  { %61 = vmax.xlane.f32.xlu0 %v60_v15  ;;  %v120_v30 = vadd.f32 %v119_v26, %v113_v25 }
  0x24   :  { %v103_v37 = vadd.f32 %v102_v33, %v48_v27 }
  0x25   :  { %v121_v35 = vadd.f32 %v120_v30, %v114_v31 }
  0x26   :  { %v104_v41 = vadd.f32 %v103_v37, %v49_v28 }
  0x27   :  { %v122_v40 = vadd.f32 %v121_v35, %v115_v32 }
  0x28   :  { %v105_v43 = vadd.f32 %v104_v41, %v50_v34 }
  0x29   :  { %v123_v44 = vadd.f32 %v122_v40, %v116_v38 }
  0x2a   :  { %v107_v46 = vadd.f32 %v106_v42, %v105_v43 }
  0x2b   :  { %v125_v47 = vadd.f32 %v124_v45, %v123_v44 }
  0x2c   :  { %108 = vadd.xlane.f32.xlu1 %v107_v46 }
  0x30   :  { %126 = vadd.xlane.f32.xlu1 %v125_v47 }
  0xac   :  { %v62_v48 = vpop.xlane.xlu0 %61 }
  0xad   :  { %v63_v49 = vsub.f32 %v36_v0, %v62_v48  ;;  %v64_v50 = vsub.f32 %v37_v1, %v62_v48  ;;  %v65_v51 = vsub.f32 %v38_v2, %v62_v48  ;;  %v66_v52 = vsub.f32 %v39_v3, %v62_v48 }
  0xae   :  { %v67_v56 = vsub.f32 %v272_v4, %v62_v48  ;;  %v68_v57 = vsub.f32 %v274_v5, %v62_v48  ;;  %v70_v59 = vsub.f32 %v278_v7, %v62_v48  ;;  %v69_v60 = vsub.f32 %v276_v6, %v62_v48 }
  0xaf   :  { %v71_v53 = vmul.f32 1.442695, %v63_v49  ;;  %v73_v54 = vmul.f32 1.442695, %v64_v50  ;;  %v75_v55 = vmul.f32 1.442695, %v65_v51 }
  0xb0   :  { %v77_v58 = vmul.f32 1.442695, %v66_v52  ;;  %v79_v61 = vmul.f32 1.442695, %v67_v56  ;;  %v81_v62 = vmul.f32 1.442695, %v68_v57 }
  0xb1   :  { %164 = vpow2.f32 %v71_v53  ;;  %v85_v63 = vmul.f32 1.442695, %v70_v59  ;;  %v83_v0 = vmul.f32 1.442695, %v69_v60 }
  0xb2   :  { %166 = vpow2.f32 %v73_v54 }
  0xb3   :  { %168 = vpow2.f32 %v75_v55 }
  0xb4   :  { %170 = vpow2.f32 %v77_v58 }
  0xb5   :  { %172 = vpow2.f32 %v79_v61  ;;  %v109_v18 = vpop.xlane.xlu1 %108 }
  0xb6   :  { %174 = vpow2.f32 %v81_v62 }
  0xb7   :  { %176 = vpow2.f32 %v85_v63 }
  0xb8   :  { %178 = vpow2.f32 %v83_v0 }
  0xb9   :  { %v127_v22 = vpop.xlane.xlu1 %126 }
  0xbe   :  { %v165_v1 = vpop.eup %164 }
  0xbf   :  { %v167_v2 = vpop.eup %166 }
  0xc0   :  { %v87_v3 = vadd.f32 %v167_v2, %v165_v1  ;;  %v169_v4 = vpop.eup %168 }
  0xc1   :  { %v171_v8 = vpop.eup %170 }
  0xc2   :  { %v88_v5 = vadd.f32 %v169_v4, %v87_v3  ;;  %v173_v7 = vpop.eup %172 }
  0xc3   :  { %v175_v6 = vpop.eup %174 }
  0xc4   :  { %v89_v9 = vadd.f32 %v171_v8, %v88_v5  ;;  %v177_v11 = vpop.eup %176 }
  0xc5   :  { %v179_v13 = vpop.eup %178  ;;  %v93_v15 = vsel %vm55_vm0, %v177_v11, 0.0 }
  0xc6   :  { %v90_v10 = vadd.f32 %v173_v7, %v89_v9 }
  0xc8   :  { %v91_v12 = vadd.f32 %v175_v6, %v90_v10 }
  0xca   :  { %v92_v14 = vadd.f32 %v179_v13, %v91_v12 }
  0xcc   :  { %v94_v16 = vadd.f32 %v93_v15, %v92_v14 }
  0xce   :  { %95 = vadd.xlane.f32.xlu0 %v94_v16 }
 0x157   :  { %v96_v17 = vpop.xlane.xlu0 %95 }
 0x158   :  { %180 = vlog2.f32 %v96_v17 }
 0x165   :  { %v181_v19 = vpop.eup %180 }
 0x166   :  { %v98_v20 = vmul.f32 0.6931472, %v181_v19 }
 0x168   :  { %v99_v21 = vadd.f32 %v98_v20, %v62_v48 }
 0x16a   :  { %v128_v23 = vmul.f32 %v109_v18, %v99_v21 }
 0x16c   :  { %v129_v24 = vsub.f32 %v128_v23, %v127_v22 }
 0x16e   :  { %v131_v25 = vsel %vm130_vm1, %v129_v24, 0.0 }
 0x16f   :  { %132 = vadd.xlane.f32.xlu0 %v131_v25 }
 0x1f8   :  { %v133_v26 = vpop.xlane.xlu0 %132 }
 0x1f9   :  { %v134_v27 = vrot.slane %v133_v26, 4 }
 0x1fb   :  { %v135_v28 = vadd.f32 %v134_v27, %v133_v26 }
 0x1fd   :  { %v136_v29 = vrot.slane %v135_v28, 2 }
 0x1ff   :  { %v137_v30 = vadd.f32 %v136_v29, %v135_v28 }
 0x201   :  { %v138_v31 = vrot.slane %v137_v30, 1 }
 0x203   :  { %v139_v32 = vadd.f32 %v138_v31, %v137_v30 }
 0x205   :  { %159 = vpush %v139_v32 }
 0x236   :  { %s160_s19 = spop %159 }
 0x237   :  { %v141_v33 = vstv %s160_s19 }
 0x238   :  { %142 = vst [vmem:[#allocation7] sm:$0xff] %v141_v33 }
 0x239   :  { %233 = shalt.err (!%p230_p0)
}
 0x23a   :  { %152 = dma.vmem_to_hbm [thread:$0]  %s150_s1, 128, %s301_s2, [#allocation4]  }
 0x23b   :  { %246 = dma.done.wait [#allocation4], 128  }
 0x23c   :  { %247 = vsyncadd [#allocation4], 4294967168 }
 0x23d   :  { %156 = vsyncpa [#allocation3], 1 }
 0x23e   :  { %157 = vsyncpa [#allocation6], 1 }
 0x23f   :  { %158 = vsyncpa [#allocation4], 1 }

</bundles_post_ra>
